<compile_context>
chip_gen: v7x
topology: tpu7x:2x2x1
jax: 0.10.0
libtpu: 0.0.40
codegen_flags: <defaults>
</compile_context>

<pallas_src>
import jax
import jax.numpy as jnp
from jax.experimental import pallas as pl
from jax.experimental.pallas import tpu as pltpu


def _ae_linear_kernel(x_ref, w_ref, o_ref):
    # x_ref : (L, J, K, Bt)   lane axis = batch tile
    # w_ref : (L, J, NV)      whole weight tensor, VMEM resident
    # o_ref : (J, NV, K, Bt)
    L = x_ref.shape[0]

    acc = None
    for l in range(L):                                   # L=4, fully unrolled
        x_l = x_ref[l].astype(jnp.float32)               # (J, K, Bt)
        w_l = w_ref[l].astype(jnp.float32)               # (J, NV)
        # One broadcast-FMA per locality: (J,1,K,Bt) * (J,NV,1,1) -> (J,NV,K,Bt)
        term = x_l[:, None, :, :] * w_l[:, :, None, None]
        acc = term if acc is None else acc + term

    o_ref[...] = acc.astype(o_ref.dtype)


def ae_linear_pallas(x, weights, *, block_b=512):
    """x: (B, L, J, K), weights: (L, J, NV) -> (B, J, NV, K)."""
    B, L, J, K = x.shape
    Lw, Jw, NV = weights.shape
    assert (L, J) == (Lw, Jw), "x / weights shape mismatch"

    # Put the big axis (B) on lanes: kernel consumes (L, J, K, B).
    x_t = jnp.transpose(x, (1, 2, 3, 0))

    # Lane-dense batch tile: whole B when small, else a multiple of 128.
    if B <= block_b:
        bt = B
    else:
        bt = block_b
        assert bt % 128 == 0, "batch tile must be lane-aligned (multiple of 128)"
    grid = (pl.cdiv(B, bt),)

    out_t = pl.pallas_call(
        _ae_linear_kernel,
        out_shape=jax.ShapeDtypeStruct((J, NV, K, B), x.dtype),
        grid=grid,
        in_specs=[
            # x tile: full (L, J, K), batch tiled along the lane axis.
            pl.BlockSpec((L, J, K, bt), lambda i: (0, 0, 0, i)),
            # weights: tiny, same block every step (stays VMEM resident).
            pl.BlockSpec((L, J, NV), lambda i: (0, 0, 0)),
        ],
        out_specs=pl.BlockSpec((J, NV, K, bt), lambda i: (0, 0, 0, i)),
        compiler_params=pltpu.CompilerParams(
            # Independent batch tiles: shard across TensorCores (v7x megacore).
            dimension_semantics=("parallel",),
        ),
    )(x_t, weights)

    # (J, NV, K, B) -> (B, J, NV, K) back to PyTorch's output layout.
    return jnp.transpose(out_t, (3, 0, 1, 2))


if __name__ == "__main__":
    # Small shapes consistent with the module: locality=4, hidden=8,
    # num_out_vectors=6, batch=2, K=3 (3-D vectors, as in a backmapper).
    B, locality, hidden, num_out_vectors, K = 2, 4, 8, 6, 3

    key = jax.random.PRNGKey(0)
    kx, kw = jax.random.split(key)
    x = jax.random.normal(kx, (B, locality, hidden, K), dtype=jnp.float32)
    # Deterministic stand-in for torch.randn(locality, hidden, num_out_vectors).
    weights = jax.random.normal(kw, (locality, hidden, num_out_vectors),
                                dtype=jnp.float32)

    out = jax.block_until_ready(ae_linear_pallas(x, weights))

    # Correctness check against the pure-JAX reference of the einsum.
    ref = jnp.einsum('bijk,ijl->bjlk', x, weights)
    assert out.shape == (B, hidden, num_out_vectors, K)
    assert jnp.allclose(out, ref, atol=1e-5, rtol=1e-5), "mismatch vs reference"

    print("KERNEL_OK")
</pallas_src>

<mosaic_0001>
module attributes {stable_mosaic.version = 11 : i64} {
  func.func @_ae_linear_kernel(%arg0: i32, %arg1: memref<4x8x3x2xf32, #tpu.memory_space<vmem>>, %arg2: memref<4x8x6xf32, #tpu.memory_space<vmem>>, %arg3: memref<8x6x3x2xf32, #tpu.memory_space<vmem>>) attributes {dimension_semantics = [#tpu.dimension_semantics<parallel>], iteration_bounds = array<i64: 1>, scalar_prefetch = 0 : i64, scratch_operands = 0 : i64, tpu.core_type = #tpu.core_type<tc>, window_params = [{transform_indices = @transform_0, window_bounds = array<i64: 4, 8, 3, 2>}, {pipeline_mode = #tpu.pipeline_mode<synchronous>, transform_indices = @transform_1, window_bounds = array<i64: 4, 8, 6>}, {transform_indices = @transform_2, window_bounds = array<i64: 8, 6, 3, 2>}]} {
    %c0 = arith.constant 0 : index
    %c0_0 = arith.constant 0 : index
    %c0_1 = arith.constant 0 : index
    %c0_2 = arith.constant 0 : index
    %0 = vector.load %arg1[%c0, %c0_0, %c0_1, %c0_2] : memref<4x8x3x2xf32, #tpu.memory_space<vmem>>, vector<1x8x3x2xf32>
    %1 = vector.shape_cast %0 : vector<1x8x3x2xf32> to vector<8x3x2xf32>
    %c0_3 = arith.constant 0 : index
    %c0_4 = arith.constant 0 : index
    %c0_5 = arith.constant 0 : index
    %2 = vector.load %arg2[%c0_3, %c0_4, %c0_5] : memref<4x8x6xf32, #tpu.memory_space<vmem>>, vector<1x8x6xf32>
    %3 = vector.shape_cast %2 : vector<1x8x6xf32> to vector<8x6xf32>
    %4 = vector.shape_cast %1 : vector<8x3x2xf32> to vector<8x1x3x2xf32>
    %5 = vector.shape_cast %3 : vector<8x6xf32> to vector<8x6x1x1xf32>
    %6 = vector.broadcast %4 : vector<8x1x3x2xf32> to vector<8x6x3x2xf32>
    %7 = vector.broadcast %5 : vector<8x6x1x1xf32> to vector<8x6x3x2xf32>
    %8 = arith.mulf %6, %7 : vector<8x6x3x2xf32>
    %c1 = arith.constant 1 : index
    %c0_6 = arith.constant 0 : index
    %c0_7 = arith.constant 0 : index
    %c0_8 = arith.constant 0 : index
    %9 = vector.load %arg1[%c1, %c0_6, %c0_7, %c0_8] : memref<4x8x3x2xf32, #tpu.memory_space<vmem>>, vector<1x8x3x2xf32>
    %10 = vector.shape_cast %9 : vector<1x8x3x2xf32> to vector<8x3x2xf32>
    %c1_9 = arith.constant 1 : index
    %c0_10 = arith.constant 0 : index
    %c0_11 = arith.constant 0 : index
    %11 = vector.load %arg2[%c1_9, %c0_10, %c0_11] : memref<4x8x6xf32, #tpu.memory_space<vmem>>, vector<1x8x6xf32>
    %12 = vector.shape_cast %11 : vector<1x8x6xf32> to vector<8x6xf32>
    %13 = vector.shape_cast %10 : vector<8x3x2xf32> to vector<8x1x3x2xf32>
    %14 = vector.shape_cast %12 : vector<8x6xf32> to vector<8x6x1x1xf32>
    %15 = vector.broadcast %13 : vector<8x1x3x2xf32> to vector<8x6x3x2xf32>
    %16 = vector.broadcast %14 : vector<8x6x1x1xf32> to vector<8x6x3x2xf32>
    %17 = arith.mulf %15, %16 : vector<8x6x3x2xf32>
    %18 = arith.addf %8, %17 : vector<8x6x3x2xf32>
    %c2 = arith.constant 2 : index
    %c0_12 = arith.constant 0 : index
    %c0_13 = arith.constant 0 : index
    %c0_14 = arith.constant 0 : index
    %19 = vector.load %arg1[%c2, %c0_12, %c0_13, %c0_14] : memref<4x8x3x2xf32, #tpu.memory_space<vmem>>, vector<1x8x3x2xf32>
    %20 = vector.shape_cast %19 : vector<1x8x3x2xf32> to vector<8x3x2xf32>
    %c2_15 = arith.constant 2 : index
    %c0_16 = arith.constant 0 : index
    %c0_17 = arith.constant 0 : index
    %21 = vector.load %arg2[%c2_15, %c0_16, %c0_17] : memref<4x8x6xf32, #tpu.memory_space<vmem>>, vector<1x8x6xf32>
    %22 = vector.shape_cast %21 : vector<1x8x6xf32> to vector<8x6xf32>
    %23 = vector.shape_cast %20 : vector<8x3x2xf32> to vector<8x1x3x2xf32>
    %24 = vector.shape_cast %22 : vector<8x6xf32> to vector<8x6x1x1xf32>
    %25 = vector.broadcast %23 : vector<8x1x3x2xf32> to vector<8x6x3x2xf32>
    %26 = vector.broadcast %24 : vector<8x6x1x1xf32> to vector<8x6x3x2xf32>
    %27 = arith.mulf %25, %26 : vector<8x6x3x2xf32>
    %28 = arith.addf %18, %27 : vector<8x6x3x2xf32>
    %c3 = arith.constant 3 : index
    %c0_18 = arith.constant 0 : index
    %c0_19 = arith.constant 0 : index
    %c0_20 = arith.constant 0 : index
    %29 = vector.load %arg1[%c3, %c0_18, %c0_19, %c0_20] : memref<4x8x3x2xf32, #tpu.memory_space<vmem>>, vector<1x8x3x2xf32>
    %30 = vector.shape_cast %29 : vector<1x8x3x2xf32> to vector<8x3x2xf32>
    %c3_21 = arith.constant 3 : index
    %c0_22 = arith.constant 0 : index
    %c0_23 = arith.constant 0 : index
    %31 = vector.load %arg2[%c3_21, %c0_22, %c0_23] : memref<4x8x6xf32, #tpu.memory_space<vmem>>, vector<1x8x6xf32>
    %32 = vector.shape_cast %31 : vector<1x8x6xf32> to vector<8x6xf32>
    %33 = vector.shape_cast %30 : vector<8x3x2xf32> to vector<8x1x3x2xf32>
    %34 = vector.shape_cast %32 : vector<8x6xf32> to vector<8x6x1x1xf32>
    %35 = vector.broadcast %33 : vector<8x1x3x2xf32> to vector<8x6x3x2xf32>
    %36 = vector.broadcast %34 : vector<8x6x1x1xf32> to vector<8x6x3x2xf32>
    %37 = arith.mulf %35, %36 : vector<8x6x3x2xf32>
    %38 = arith.addf %28, %37 : vector<8x6x3x2xf32>
    %c0_24 = arith.constant 0 : index
    %c0_25 = arith.constant 0 : index
    %c0_26 = arith.constant 0 : index
    %c0_27 = arith.constant 0 : index
    %39 = vector.load %arg3[%c0_24, %c0_25, %c0_26, %c0_27] : memref<8x6x3x2xf32, #tpu.memory_space<vmem>>, vector<8x6x3x2xf32>
    tpu.vector_store %arg3[%c0_24, %c0_25, %c0_26, %c0_27], %38 {strides = array<i32>} : memref<8x6x3x2xf32, #tpu.memory_space<vmem>>, vector<8x6x3x2xf32>,
    return
  }
  func.func @transform_0(%arg0: i32) -> (i32, i32, i32, i32) {
    %c0_i32 = arith.constant 0 : i32
    %c0_i32_0 = arith.constant 0 : i32
    %c0_i32_1 = arith.constant 0 : i32
    %c0_i32_2 = arith.constant 0 : i32
    return %c0_i32, %c0_i32_0, %c0_i32_1, %arg0 : i32, i32, i32, i32
  }
  func.func @transform_1(%arg0: i32) -> (i32, i32, i32) {
    %c0_i32 = arith.constant 0 : i32
    %c0_i32_0 = arith.constant 0 : i32
    %c0_i32_1 = arith.constant 0 : i32
    %c0_i32_2 = arith.constant 0 : i32
    return %c0_i32, %c0_i32_0, %c0_i32_1 : i32, i32, i32
  }
  func.func @transform_2(%arg0: i32) -> (i32, i32, i32, i32) {
    %c0_i32 = arith.constant 0 : i32
    %c0_i32_0 = arith.constant 0 : i32
    %c0_i32_1 = arith.constant 0 : i32
    %c0_i32_2 = arith.constant 0 : i32
    return %c0_i32, %c0_i32_0, %c0_i32_1, %arg0 : i32, i32, i32, i32
  }
}

</mosaic_0001>

<bundles_post_ra>
// kernel: tpu_custom_call.1
= control target key start
LH: loop header
LB: loop body
LE: loop exit
PB: predicated region body
PF: predicated region fallthrough
CT: control target
= control target key end

     0   :  { %v20_v0 = vlaneseq  ;;  %vm1381_vm0 = vcmask 10240   ;;  %s2452_s1 = inlined_call_operand.vmem [shape: f32[4,8,6], index: 1, kind: input, shape index: {}]   ;;  %s2453_s0 = inlined_call_operand.vmem [shape: f32[4,8,3,2], index: 0, kind: input, shape index: {}]   ;;  %s2454_s2 = inlined_call_operand.vmem [shape: f32[8,6,3,2], index: 2, kind: output, shape index: {}]  }
   0x1   :  { %v19_v2 = vld [vmem:[%s2452_s1] sm:$0xff]  ;;  %v1442_v19 = vld [vmem:[%s2452_s1 + $0x8] sm:$0xff]  ;;  %v1451_v28 = vld [vmem:[%s2452_s1 + $0x10] sm:$0xff] }
   0x2   :  { %v21_v1 = vshrl.u32 %v20_v0, 7  ;;  %v1460_v37 = vld [vmem:[%s2452_s1 + $0x18] sm:$0xff]  ;;  %v13_v47 = vld [vmem:[%s2453_s0 + $0x8] sm:$0x7]  ;;  %v11_v59 = vld [vmem:[%s2453_s0] sm:$0x7] }
   0x4   :  { %v1479_v3 = vsub.s32 2, %v21_v1  ;;  %v1481_v4 = vsub.s32 0, %v21_v1  ;;  %v1483_v5 = vsub.s32 3, %v21_v1  ;;  %v1485_v6 = vsub.s32 1, %v21_v1 }
   0x5   :  { %v1491_v11 = vsub.s32 5, %v21_v1  ;;  %v1493_v12 = vsub.s32 4, %v21_v1  ;;  %v71_v15 = vsub.s32 7, %v21_v1  ;;  %v64_v16 = vsub.s32 6, %v21_v1 }
   0x6   :  { %v37_v7 = vrot.slane %v19_v2, %v1479_v3  ;;  %v23_v8 = vrot.slane %v19_v2, %v1481_v4  ;;  %v44_v9 = vrot.slane %v19_v2, %v1483_v5  ;;  %v30_v10 = vrot.slane %v19_v2, %v1485_v6 }
   0x7   :  { %v58_v13 = vrot.slane %v19_v2, %v1491_v11  ;;  %v51_v14 = vrot.slane %v19_v2, %v1493_v12  ;;  %v72_v17 = vrot.slane %v19_v2, %v71_v15  ;;  %v65_v18 = vrot.slane %v19_v2, %v64_v16 }
   0x8   :  { %39 = vbcast.lane.b32.xlu1 %v37_v7, 256  ;;  %25 = vbcast.lane.b32.xlu0 %v23_v8, 256  ;;  %v337_v20 = vrot.slane %v1442_v19, %v1485_v6  ;;  %v330_v21 = vrot.slane %v1442_v19, %v1481_v4  ;;  %v351_v22 = vrot.slane %v1442_v19, %v1483_v5 }
   0x9   :  { %v344_v23 = vrot.slane %v1442_v19, %v1479_v3  ;;  %v365_v24 = vrot.slane %v1442_v19, %v1491_v11  ;;  %v358_v25 = vrot.slane %v1442_v19, %v1493_v12  ;;  %v379_v26 = vrot.slane %v1442_v19, %v71_v15 }
   0xa   :  { %v372_v27 = vrot.slane %v1442_v19, %v64_v16  ;;  %v692_v29 = vrot.slane %v1451_v28, %v1485_v6  ;;  %v685_v30 = vrot.slane %v1451_v28, %v1481_v4  ;;  %v706_v31 = vrot.slane %v1451_v28, %v1483_v5 }
   0xb   :  { %v699_v32 = vrot.slane %v1451_v28, %v1479_v3  ;;  %v720_v33 = vrot.slane %v1451_v28, %v1491_v11  ;;  %v713_v34 = vrot.slane %v1451_v28, %v1493_v12  ;;  %v734_v35 = vrot.slane %v1451_v28, %v71_v15 }
   0xc   :  { %46 = vbcast.lane.b32.xlu1 %v44_v9, 256  ;;  %32 = vbcast.lane.b32.xlu0 %v30_v10, 256  ;;  %v727_v36 = vrot.slane %v1451_v28, %v64_v16  ;;  %v1047_v38 = vrot.slane %v1460_v37, %v1485_v6  ;;  %v1040_v39 = vrot.slane %v1460_v37, %v1481_v4 }
   0xd   :  { %v1061_v40 = vrot.slane %v1460_v37, %v1483_v5  ;;  %v1054_v41 = vrot.slane %v1460_v37, %v1479_v3  ;;  %v1075_v42 = vrot.slane %v1460_v37, %v1491_v11  ;;  %v1068_v43 = vrot.slane %v1460_v37, %v1493_v12 }
   0xe   :  { %v1089_v44 = vrot.slane %v1460_v37, %v71_v15  ;;  %v1082_v45 = vrot.slane %v1460_v37, %v64_v16 }
  0x10   :  { %60 = vbcast.lane.b32.xlu1 %v58_v13, 256  ;;  %53 = vbcast.lane.b32.xlu0 %v51_v14, 256  ;;  %v14_v13 = vld [vmem:[%s2453_s0 + $0xc] sm:$0x7] }
  0x14   :  { %74 = vbcast.lane.b32.xlu1 %v72_v17, 256  ;;  %67 = vbcast.lane.b32.xlu0 %v65_v18, 256 }
  0x18   :  { %339 = vbcast.lane.b32.xlu1 %v337_v20, 256  ;;  %332 = vbcast.lane.b32.xlu0 %v330_v21, 256 }
  0x1c   :  { %353 = vbcast.lane.b32.xlu1 %v351_v22, 256  ;;  %346 = vbcast.lane.b32.xlu0 %v344_v23, 256 }
  0x20   :  { %367 = vbcast.lane.b32.xlu1 %v365_v24, 256  ;;  %360 = vbcast.lane.b32.xlu0 %v358_v25, 256 }
  0x24   :  { %381 = vbcast.lane.b32.xlu1 %v379_v26, 256  ;;  %374 = vbcast.lane.b32.xlu0 %v372_v27, 256  ;;  %v12_v27 = vld [vmem:[%s2453_s0 + $0x4] sm:$0x7] }
  0x28   :  { %694 = vbcast.lane.b32.xlu1 %v692_v29, 256  ;;  %687 = vbcast.lane.b32.xlu0 %v685_v30, 256 }
  0x2c   :  { %708 = vbcast.lane.b32.xlu1 %v706_v31, 256  ;;  %701 = vbcast.lane.b32.xlu0 %v699_v32, 256 }
  0x30   :  { %722 = vbcast.lane.b32.xlu1 %v720_v33, 256  ;;  %715 = vbcast.lane.b32.xlu0 %v713_v34, 256 }
  0x34   :  { %736 = vbcast.lane.b32.xlu1 %v734_v35, 256  ;;  %729 = vbcast.lane.b32.xlu0 %v727_v36, 256 }
  0x38   :  { %1049 = vbcast.lane.b32.xlu1 %v1047_v38, 256  ;;  %1042 = vbcast.lane.b32.xlu0 %v1040_v39, 256 }
  0x3c   :  { %1063 = vbcast.lane.b32.xlu1 %v1061_v40, 256  ;;  %1056 = vbcast.lane.b32.xlu0 %v1054_v41, 256  ;;  %v16_v41 = vld [vmem:[%s2453_s0 + $0x14] sm:$0x7] }
  0x40   :  { %1077 = vbcast.lane.b32.xlu1 %v1075_v42, 256  ;;  %1070 = vbcast.lane.b32.xlu0 %v1068_v43, 256 }
  0x44   :  { %1091 = vbcast.lane.b32.xlu1 %v1089_v44, 256  ;;  %1084 = vbcast.lane.b32.xlu0 %v1082_v45, 256 }
  0x7a   :  { %v40_v46 = vpop.permute.xlu1 %39  ;;  %v26_v48 = vpop.permute.xlu0 %25 }
  0x7b   :  { %v127_v49 = vrot.slane %v40_v46, %v1481_v4  ;;  %v131_v50 = vrot.slane %v40_v46, %v1485_v6  ;;  %v135_v51 = vrot.slane %v40_v46, %v1479_v3  ;;  %v139_v52 = vrot.slane %v40_v46, %v1483_v5 }
  0x7c   :  { %v143_v53 = vrot.slane %v40_v46, %v1493_v12  ;;  %v147_v54 = vrot.slane %v40_v46, %v1491_v11  ;;  %v79_v55 = vrot.slane %v26_v48, %v1481_v4  ;;  %v83_v56 = vrot.slane %v26_v48, %v1485_v6 }
  0x7d   :  { %v1535_v57 = vmul.f32 %v127_v49, %v13_v47  ;;  %v1537_v58 = vmul.f32 %v131_v50, %v13_v47  ;;  %v1542_v60 = vmul.f32 %v135_v51, %v13_v47  ;;  %v1544_v61 = vmul.f32 %v139_v52, %v13_v47 }
  0x7e   :  { %v87_v62 = vrot.slane %v26_v48, %v1479_v3  ;;  %v91_v63 = vrot.slane %v26_v48, %v1483_v5  ;;  %v47_v0 = vpop.permute.xlu1 %46  ;;  %v1548_v1 = vmul.f32 %v143_v53, %v13_v47  ;;  %v1550_v2 = vmul.f32 %v147_v54, %v13_v47  ;;  %v33_v16 = vpop.permute.xlu0 %32 }
  0x7f   :  { %v95_v7 = vrot.slane %v26_v48, %v1493_v12  ;;  %v99_v8 = vrot.slane %v26_v48, %v1491_v11  ;;  %v1554_v9 = vmul.f32 %v79_v55, %v11_v59  ;;  %v1556_v10 = vmul.f32 %v83_v56, %v11_v59  ;;  %v15_v55 = vld [vmem:[%s2453_s0 + $0x10] sm:$0x7] }
  0x80   :  { %v151_v14 = vrot.slane %v47_v0, %v1481_v4  ;;  %v155_v15 = vrot.slane %v47_v0, %v1485_v6  ;;  %v1563_v17 = vmul.f32 %v87_v62, %v11_v59  ;;  %v1565_v18 = vmul.f32 %v91_v63, %v11_v59 }
  0x81   :  { %v159_v19 = vrot.slane %v47_v0, %v1479_v3  ;;  %v163_v20 = vrot.slane %v47_v0, %v1483_v5  ;;  %v1569_v21 = vmul.f32 %v95_v7, %v11_v59  ;;  %v1571_v22 = vmul.f32 %v99_v8, %v11_v59 }
  0x82   :  { %v167_v23 = vrot.slane %v47_v0, %v1493_v12  ;;  %v171_v24 = vrot.slane %v47_v0, %v1491_v11  ;;  %v1575_v25 = vmul.f32 %v151_v14, %v14_v13  ;;  %v1577_v26 = vmul.f32 %v155_v15, %v14_v13  ;;  %v61_v30 = vpop.permute.xlu1 %60  ;;  %v54_v44 = vpop.permute.xlu0 %53 }
  0x83   :  { %v103_v28 = vrot.slane %v33_v16, %v1481_v4  ;;  %v107_v29 = vrot.slane %v33_v16, %v1485_v6  ;;  %v1584_v31 = vmul.f32 %v159_v19, %v14_v13  ;;  %v1586_v32 = vmul.f32 %v163_v20, %v14_v13 }
  0x84   :  { %v111_v33 = vrot.slane %v33_v16, %v1479_v3  ;;  %v115_v34 = vrot.slane %v33_v16, %v1483_v5  ;;  %v1590_v35 = vmul.f32 %v167_v23, %v14_v13  ;;  %v1592_v36 = vmul.f32 %v171_v24, %v14_v13  ;;  %v18_v23 = vld [vmem:[%s2453_s0 + $0x1c] sm:$0x7] }
  0x85   :  { %v119_v37 = vrot.slane %v33_v16, %v1493_v12  ;;  %v123_v38 = vrot.slane %v33_v16, %v1491_v11  ;;  %v1596_v39 = vmul.f32 %v103_v28, %v12_v27  ;;  %v1598_v40 = vmul.f32 %v107_v29, %v12_v27 }
  0x86   :  { %v199_v42 = vrot.slane %v61_v30, %v1481_v4  ;;  %v203_v43 = vrot.slane %v61_v30, %v1485_v6  ;;  %v1605_v45 = vmul.f32 %v111_v33, %v12_v27  ;;  %v1607_v46 = vmul.f32 %v115_v34, %v12_v27  ;;  %v75_v62 = vpop.permute.xlu1 %74  ;;  %v68_v28 = vpop.permute.xlu0 %67 }
  0x87   :  { %v207_v47 = vrot.slane %v61_v30, %v1479_v3  ;;  %v211_v48 = vrot.slane %v61_v30, %v1483_v5  ;;  %v1611_v49 = vmul.f32 %v119_v37, %v12_v27  ;;  %v1613_v50 = vmul.f32 %v123_v38, %v12_v27 }
  0x88   :  { %v215_v51 = vrot.slane %v61_v30, %v1493_v12  ;;  %v219_v52 = vrot.slane %v61_v30, %v1491_v11  ;;  %v1617_v53 = vmul.f32 %v199_v42, %v16_v41  ;;  %v1619_v54 = vmul.f32 %v203_v43, %v16_v41 }
  0x89   :  { %v175_v56 = vrot.slane %v54_v44, %v1481_v4  ;;  %v179_v59 = vrot.slane %v54_v44, %v1485_v6  ;;  %v1626_v63 = vmul.f32 %v207_v47, %v16_v41  ;;  %v1628_v0 = vmul.f32 %v211_v48, %v16_v41  ;;  %v17_v47 = vld [vmem:[%s2453_s0 + $0x18] sm:$0x7] }
  0x8a   :  { %v183_v7 = vrot.slane %v54_v44, %v1479_v3  ;;  %v187_v8 = vrot.slane %v54_v44, %v1483_v5  ;;  %v1632_v13 = vmul.f32 %v215_v51, %v16_v41  ;;  %v1634_v14 = vmul.f32 %v219_v52, %v16_v41  ;;  %v340_v52 = vpop.permute.xlu1 %339 }
  0x8b   :  { %v191_v15 = vrot.slane %v54_v44, %v1493_v12  ;;  %v195_v16 = vrot.slane %v54_v44, %v1491_v11  ;;  %v1638_v19 = vmul.f32 %v175_v56, %v15_v55  ;;  %v1640_v20 = vmul.f32 %v179_v59, %v15_v55 }
  0x8c   :  { %v247_v24 = vrot.slane %v75_v62, %v1481_v4  ;;  %v251_v27 = vrot.slane %v75_v62, %v1485_v6  ;;  %v1647_v29 = vmul.f32 %v183_v7, %v15_v55  ;;  %v1649_v30 = vmul.f32 %v187_v8, %v15_v55 }
  0x8d   :  { %v255_v33 = vrot.slane %v75_v62, %v1479_v3  ;;  %v259_v34 = vrot.slane %v75_v62, %v1483_v5  ;;  %v1653_v37 = vmul.f32 %v191_v15, %v15_v55  ;;  %v1655_v38 = vmul.f32 %v195_v16, %v15_v55 }
  0x8e   :  { %v263_v41 = vrot.slane %v75_v62, %v1493_v12  ;;  %v267_v42 = vrot.slane %v75_v62, %v1491_v11  ;;  %v1659_v43 = vmul.f32 %v247_v24, %v18_v23  ;;  %v1661_v44 = vmul.f32 %v251_v27, %v18_v23  ;;  %v1435_v24 = vld [vmem:[%s2453_s0 + $0x24] sm:$0x7] }
  0x8f   :  { %2455 = vst [vmem:[#allocation2_spill] sm:$0xff] %v1655_v38  ;;  %v223_v48 = vrot.slane %v68_v28, %v1481_v4  ;;  %v227_v51 = vrot.slane %v68_v28, %v1485_v6  ;;  %v1668_v56 = vmul.f32 %v255_v33, %v18_v23  ;;  %v1670_v55 = vmul.f32 %v259_v34, %v18_v23  ;;  %v1434_v38 = vld [vmem:[%s2453_s0 + $0x20] sm:$0x7] }
  0x90   :  { %2456 = vst [vmem:[#allocation3_spill] sm:$0xff] %v1659_v43  ;;  %2457 = vst [vmem:[#allocation4_spill] sm:$0xff] %v1661_v44  ;;  %v231_v59 = vrot.slane %v68_v28, %v1479_v3  ;;  %v235_v62 = vrot.slane %v68_v28, %v1483_v5  ;;  %v1674_v7 = vmul.f32 %v263_v41, %v18_v23  ;;  %v333_v41 = vpop.permute.xlu0 %332 }
  0x91   :  { %2458 = vst [vmem:[#allocation5_spill] sm:$0xff] %v1668_v56  ;;  %2459 = vst [vmem:[#allocation6_spill] sm:$0xff] %v1670_v55  ;;  %v1676_v8 = vmul.f32 %v267_v42, %v18_v23  ;;  %v239_v15 = vrot.slane %v68_v28, %v1493_v12  ;;  %v243_v16 = vrot.slane %v68_v28, %v1491_v11 }
  0x92   :  { %2460 = vst [vmem:[#allocation7_spill] sm:$0xff] %v1674_v7  ;;  %v1683_v27 = vmul.f32 %v223_v48, %v17_v47  ;;  %v1685_v33 = vmul.f32 %v227_v51, %v17_v47  ;;  %v410_v34 = vrot.slane %v340_v52, %v1481_v4  ;;  %v414_v55 = vrot.slane %v340_v52, %v1485_v6 }
  0x93   :  { %2461 = vst [vmem:[#allocation8_spill] sm:$0xff] %v1676_v8  ;;  %v1689_v7 = vmul.f32 %v231_v59, %v17_v47  ;;  %v1691_v23 = vmul.f32 %v235_v62, %v17_v47  ;;  %v418_v42 = vrot.slane %v340_v52, %v1479_v3  ;;  %v422_v28 = vrot.slane %v340_v52, %v1483_v5 }
  0x94   :  { %2462 = vst [vmem:[#allocation9_spill] sm:$0xff] %v1683_v27  ;;  %2463 = vst [vmem:[#allocation10_spill] sm:$0xff] %v1685_v33  ;;  %v426_v8 = vrot.slane %v340_v52, %v1493_v12  ;;  %v430_v48 = vrot.slane %v340_v52, %v1491_v11  ;;  %v581_v27 = vmul.f32 %v1435_v24, %v410_v34 }
  0x95   :  { %2464 = vst [vmem:[#allocation11_spill] sm:$0xff] %v1689_v7  ;;  %2465 = vst [vmem:[#allocation12_spill] sm:$0xff] %v1691_v23  ;;  %v582_v51 = vmul.f32 %v1435_v24, %v414_v55  ;;  %v583_v33 = vmul.f32 %v1435_v24, %v418_v42  ;;  %v584_v56 = vmul.f32 %v1435_v24, %v422_v28 }
  0x96   :  { %v386_v44 = vrot.slane %v333_v41, %v1481_v4  ;;  %v390_v43 = vrot.slane %v333_v41, %v1485_v6  ;;  %v1699_v59 = vmul.f32 %v239_v15, %v17_v47  ;;  %v1701_v62 = vmul.f32 %v243_v16, %v17_v47  ;;  %v354_v15 = vpop.permute.xlu1 %353 }
  0x97   :  { %v585_v23 = vmul.f32 %v1435_v24, %v426_v8  ;;  %v586_v7 = vmul.f32 %v1435_v24, %v430_v48  ;;  %v1707_v52 = vadd.f32 %v581_v27, %v1596_v39  ;;  %v1710_v55 = vadd.f32 %v582_v51, %v1598_v40 }
  0x98   :  { %v394_v34 = vrot.slane %v333_v41, %v1479_v3  ;;  %v398_v42 = vrot.slane %v333_v41, %v1483_v5  ;;  %v1715_v47 = vadd.f32 %v583_v33, %v1605_v45  ;;  %v1718_v8 = vadd.f32 %v584_v56, %v1607_v46  ;;  %v1437_v45 = vld [vmem:[%s2453_s0 + $0x2c] sm:$0x7] }
  0x99   :  { %v402_v16 = vrot.slane %v333_v41, %v1493_v12  ;;  %v406_v24 = vrot.slane %v333_v41, %v1491_v11  ;;  %v575_v39 = vmul.f32 %v1434_v38, %v386_v44  ;;  %v576_v27 = vmul.f32 %v1434_v38, %v390_v43 }
  0x9a   :  { %v577_v28 = vmul.f32 %v1434_v38, %v394_v34  ;;  %v578_v40 = vmul.f32 %v1434_v38, %v398_v42  ;;  %v1723_v48 = vadd.f32 %v585_v23, %v1611_v49  ;;  %v1726_v51 = vadd.f32 %v586_v7, %v1613_v50  ;;  %v347_v49 = vpop.permute.xlu0 %346 }
  0x9b   :  { %v458_v46 = vrot.slane %v354_v15, %v1481_v4  ;;  %v462_v56 = vrot.slane %v354_v15, %v1485_v6  ;;  %v579_v33 = vmul.f32 %v1434_v38, %v402_v16  ;;  %v580_v41 = vmul.f32 %v1434_v38, %v406_v24 }
  0x9c   :  { %v1734_v43 = vadd.f32 %v575_v39, %v1554_v9  ;;  %v1737_v44 = vadd.f32 %v576_v27, %v1556_v10  ;;  %v1740_v50 = vadd.f32 %v577_v28, %v1563_v17  ;;  %v1743_v7 = vadd.f32 %v578_v40, %v1565_v18 }
  0x9d   :  { %v466_v23 = vrot.slane %v354_v15, %v1479_v3  ;;  %v470_v34 = vrot.slane %v354_v15, %v1483_v5  ;;  %v474_v42 = vrot.slane %v354_v15, %v1493_v12  ;;  %v478_v38 = vrot.slane %v354_v15, %v1491_v11  ;;  %v1436_v15 = vld [vmem:[%s2453_s0 + $0x28] sm:$0x7] }
  0x9e   :  { %v593_v9 = vmul.f32 %v1437_v45, %v458_v46  ;;  %v594_v16 = vmul.f32 %v1437_v45, %v462_v56  ;;  %v434_v39 = vrot.slane %v347_v49, %v1481_v4  ;;  %v438_v17 = vrot.slane %v347_v49, %v1485_v6 }
  0x9f   :  { %v595_v24 = vmul.f32 %v1437_v45, %v466_v23  ;;  %v596_v10 = vmul.f32 %v1437_v45, %v470_v34  ;;  %v1752_v27 = vadd.f32 %v579_v33, %v1569_v21  ;;  %v1755_v18 = vadd.f32 %v580_v41, %v1571_v22  ;;  %v368_v33 = vpop.permute.xlu1 %367 }
  0xa0   :  { %v597_v28 = vmul.f32 %v1437_v45, %v474_v42  ;;  %v598_v40 = vmul.f32 %v1437_v45, %v478_v38  ;;  %v1761_v46 = vadd.f32 %v593_v9, %v1575_v25  ;;  %v1764_v56 = vadd.f32 %v594_v16, %v1577_v26 }
  0xa1   :  { %v442_v23 = vrot.slane %v347_v49, %v1479_v3  ;;  %v446_v21 = vrot.slane %v347_v49, %v1483_v5  ;;  %v1769_v22 = vadd.f32 %v595_v24, %v1584_v31  ;;  %v1772_v45 = vadd.f32 %v596_v10, %v1586_v32  ;;  %v1439_v31 = vld [vmem:[%s2453_s0 + $0x34] sm:$0x7] }
  0xa2   :  { %v450_v41 = vrot.slane %v347_v49, %v1493_v12  ;;  %v454_v34 = vrot.slane %v347_v49, %v1491_v11  ;;  %v587_v25 = vmul.f32 %v1436_v15, %v434_v39  ;;  %v588_v42 = vmul.f32 %v1436_v15, %v438_v17 }
  0xa3   :  { %v589_v38 = vmul.f32 %v1436_v15, %v442_v23  ;;  %v590_v26 = vmul.f32 %v1436_v15, %v446_v21  ;;  %v1777_v9 = vadd.f32 %v597_v28, %v1590_v35  ;;  %v1780_v16 = vadd.f32 %v598_v40, %v1592_v36  ;;  %v361_v35 = vpop.permute.xlu0 %360 }
  0xa4   :  { %v506_v32 = vrot.slane %v368_v33, %v1481_v4  ;;  %v510_v24 = vrot.slane %v368_v33, %v1485_v6  ;;  %v591_v10 = vmul.f32 %v1436_v15, %v450_v41  ;;  %v592_v49 = vmul.f32 %v1436_v15, %v454_v34 }
  0xa5   :  { %v1788_v39 = vadd.f32 %v587_v25, %v1535_v57  ;;  %v1791_v17 = vadd.f32 %v588_v42, %v1537_v58  ;;  %v1794_v36 = vadd.f32 %v589_v38, %v1542_v60  ;;  %v1797_v28 = vadd.f32 %v590_v26, %v1544_v61 }
  0xa6   :  { %v514_v40 = vrot.slane %v368_v33, %v1479_v3  ;;  %v518_v23 = vrot.slane %v368_v33, %v1483_v5  ;;  %v522_v21 = vrot.slane %v368_v33, %v1493_v12  ;;  %v526_v15 = vrot.slane %v368_v33, %v1491_v11  ;;  %v1438_v33 = vld [vmem:[%s2453_s0 + $0x30] sm:$0x7] }
  0xa7   :  { %v605_v57 = vmul.f32 %v1439_v31, %v506_v32  ;;  %v606_v41 = vmul.f32 %v1439_v31, %v510_v24  ;;  %v482_v25 = vrot.slane %v361_v35, %v1481_v4  ;;  %v486_v60 = vrot.slane %v361_v35, %v1485_v6 }
  0xa8   :  { %v607_v34 = vmul.f32 %v1439_v31, %v514_v40  ;;  %v608_v58 = vmul.f32 %v1439_v31, %v518_v23  ;;  %v1806_v42 = vadd.f32 %v591_v10, %v1548_v1  ;;  %v1809_v61 = vadd.f32 %v592_v49, %v1550_v2  ;;  %v382_v10 = vpop.permute.xlu1 %381 }
  0xa9   :  { %v609_v38 = vmul.f32 %v1439_v31, %v522_v21  ;;  %v610_v26 = vmul.f32 %v1439_v31, %v526_v15  ;;  %v1815_v32 = vadd.f32 %v605_v57, %v1617_v53  ;;  %v1818_v24 = vadd.f32 %v606_v41, %v1619_v54 }
  0xaa   :  { %v490_v40 = vrot.slane %v361_v35, %v1479_v3  ;;  %v494_v1 = vrot.slane %v361_v35, %v1483_v5  ;;  %v1823_v2 = vadd.f32 %v607_v34, %v1626_v63  ;;  %v1826_v31 = vadd.f32 %v608_v58, %v1628_v0  ;;  %v1441_v63 = vld [vmem:[%s2453_s0 + $0x3c] sm:$0x7] }
  0xab   :  { %v498_v49 = vrot.slane %v361_v35, %v1493_v12  ;;  %v502_v23 = vrot.slane %v361_v35, %v1491_v11  ;;  %v599_v53 = vmul.f32 %v1438_v33, %v482_v25  ;;  %v600_v21 = vmul.f32 %v1438_v33, %v486_v60 }
  0xac   :  { %v601_v15 = vmul.f32 %v1438_v33, %v490_v40  ;;  %v602_v54 = vmul.f32 %v1438_v33, %v494_v1  ;;  %v1831_v57 = vadd.f32 %v609_v38, %v1632_v13  ;;  %v1834_v41 = vadd.f32 %v610_v26, %v1634_v14  ;;  %v375_v13 = vpop.permute.xlu0 %374 }
  0xad   :  { %v554_v0 = vrot.slane %v382_v10, %v1481_v4  ;;  %v558_v34 = vrot.slane %v382_v10, %v1485_v6  ;;  %v603_v58 = vmul.f32 %v1438_v33, %v498_v49  ;;  %v604_v35 = vmul.f32 %v1438_v33, %v502_v23 }
  0xae   :  { %v1842_v25 = vadd.f32 %v599_v53, %v1638_v19  ;;  %v1845_v60 = vadd.f32 %v600_v21, %v1640_v20  ;;  %v1848_v14 = vadd.f32 %v601_v15, %v1647_v29  ;;  %v1851_v38 = vadd.f32 %v602_v54, %v1649_v30  ;;  %v2470_v30 = vld [vmem:[#allocation2_spill] sm:$0xff] }
  0xaf   :  { %v562_v26 = vrot.slane %v382_v10, %v1479_v3  ;;  %v566_v40 = vrot.slane %v382_v10, %v1483_v5  ;;  %v570_v1 = vrot.slane %v382_v10, %v1493_v12  ;;  %v574_v33 = vrot.slane %v382_v10, %v1491_v11  ;;  %v1440_v10 = vld [vmem:[%s2453_s0 + $0x38] sm:$0x7] }
  0xb0   :  { %2466 = vst [vmem:[#allocation13_spill] sm:$0xff] %v1845_v60  ;;  %2467 = vst [vmem:[#allocation14_spill] sm:$0xff] %v1848_v14  ;;  %v617_v19 = vmul.f32 %v1441_v63, %v554_v0  ;;  %v618_v49 = vmul.f32 %v1441_v63, %v558_v34  ;;  %v530_v53 = vrot.slane %v375_v13, %v1481_v4  ;;  %v2472_v0 = vld [vmem:[#allocation3_spill] sm:$0xff] }
  0xb1   :  { %2468 = vst [vmem:[#allocation15_spill] sm:$0xff] %v1851_v38  ;;  %v619_v23 = vmul.f32 %v1441_v63, %v562_v26  ;;  %v620_v20 = vmul.f32 %v1441_v63, %v566_v40  ;;  %v534_v29 = vrot.slane %v375_v13, %v1485_v6  ;;  %v1860_v21 = vadd.f32 %v603_v58, %v1653_v37  ;;  %v2474_v26 = vld [vmem:[#allocation4_spill] sm:$0xff]  ;;  %v695_v58 = vpop.permute.xlu1 %694 }
  0xb2   :  { %v1863_v15 = vadd.f32 %v604_v35, %v2470_v30  ;;  %v621_v54 = vmul.f32 %v1441_v63, %v570_v1  ;;  %v622_v38 = vmul.f32 %v1441_v63, %v574_v33  ;;  %v1869_v34 = vadd.f32 %v617_v19, %v2472_v0  ;;  %v2478_v1 = vld [vmem:[#allocation6_spill] sm:$0xff] }
  0xb3   :  { %2469 = vst [vmem:[#allocation16_spill] sm:$0xff] %v1860_v21  ;;  %v1872_v40 = vadd.f32 %v618_v49, %v2474_v26  ;;  %v538_v14 = vrot.slane %v375_v13, %v1479_v3  ;;  %v542_v37 = vrot.slane %v375_v13, %v1483_v5  ;;  %v2476_v21 = vld [vmem:[#allocation5_spill] sm:$0xff]  ;;  %v1880_v63 = vadd.f32 %v620_v20, %v2478_v1  ;;  %v2480_v26 = vld [vmem:[#allocation7_spill] sm:$0xff] }
  0xb4   :  { %2471 = vst [vmem:[#allocation2_spill] sm:$0xff] %v1863_v15  ;;  %2473 = vst [vmem:[#allocation3_spill] sm:$0xff] %v1869_v34  ;;  %v1877_v35 = vadd.f32 %v619_v23, %v2476_v21  ;;  %v546_v33 = vrot.slane %v375_v13, %v1493_v12  ;;  %v550_v30 = vrot.slane %v375_v13, %v1491_v11  ;;  %v2482_v15 = vld [vmem:[#allocation8_spill] sm:$0xff]  ;;  %v1444_v23 = vld [vmem:[%s2453_s0 + $0x44] sm:$0x7] }
  0xb5   :  { %2475 = vst [vmem:[#allocation4_spill] sm:$0xff] %v1872_v40  ;;  %2479 = vst [vmem:[#allocation6_spill] sm:$0xff] %v1880_v63  ;;  %v611_v19 = vmul.f32 %v1440_v10, %v530_v53  ;;  %v612_v0 = vmul.f32 %v1440_v10, %v534_v29  ;;  %v613_v34 = vmul.f32 %v1440_v10, %v538_v14  ;;  %v2484_v53 = vld [vmem:[#allocation9_spill] sm:$0xff]  ;;  %v2486_v14 = vld [vmem:[#allocation10_spill] sm:$0xff] }
  0xb6   :  { %2477 = vst [vmem:[#allocation5_spill] sm:$0xff] %v1877_v35  ;;  %v614_v49 = vmul.f32 %v1440_v10, %v542_v37  ;;  %v1885_v40 = vadd.f32 %v621_v54, %v2480_v26  ;;  %v1888_v60 = vadd.f32 %v622_v38, %v2482_v15  ;;  %v765_v20 = vrot.slane %v695_v58, %v1481_v4  ;;  %v688_v54 = vpop.permute.xlu0 %687  ;;  %v2488_v26 = vld [vmem:[#allocation11_spill] sm:$0xff]  ;;  %v2490_v15 = vld [vmem:[#allocation12_spill] sm:$0xff] }
  0xb7   :  { %v769_v21 = vrot.slane %v695_v58, %v1485_v6  ;;  %v615_v1 = vmul.f32 %v1440_v10, %v546_v33  ;;  %v616_v13 = vmul.f32 %v1440_v10, %v550_v30  ;;  %v1896_v29 = vadd.f32 %v611_v19, %v2484_v53 }
  0xb8   :  { %2481 = vst [vmem:[#allocation7_spill] sm:$0xff] %v1885_v40  ;;  %2483 = vst [vmem:[#allocation8_spill] sm:$0xff] %v1888_v60  ;;  %v1899_v37 = vadd.f32 %v612_v0, %v2486_v14  ;;  %v1902_v38 = vadd.f32 %v613_v34, %v2488_v26  ;;  %v1905_v60 = vadd.f32 %v614_v49, %v2490_v15 }
  0xb9   :  { %2485 = vst [vmem:[#allocation9_spill] sm:$0xff] %v1896_v29  ;;  %v773_v40 = vrot.slane %v695_v58, %v1479_v3  ;;  %v777_v63 = vrot.slane %v695_v58, %v1483_v5  ;;  %v781_v33 = vrot.slane %v695_v58, %v1493_v12  ;;  %v785_v10 = vrot.slane %v695_v58, %v1491_v11  ;;  %v1443_v58 = vld [vmem:[%s2453_s0 + $0x40] sm:$0x7] }
  0xba   :  { %2487 = vst [vmem:[#allocation10_spill] sm:$0xff] %v1899_v37  ;;  %2489 = vst [vmem:[#allocation11_spill] sm:$0xff] %v1902_v38  ;;  %v936_v30 = vmul.f32 %v1444_v23, %v765_v20  ;;  %v937_v19 = vmul.f32 %v1444_v23, %v769_v21  ;;  %v741_v14 = vrot.slane %v688_v54, %v1481_v4  ;;  %v709_v21 = vpop.permute.xlu1 %708 }
  0xbb   :  { %2491 = vst [vmem:[#allocation12_spill] sm:$0xff] %v1905_v60  ;;  %v938_v53 = vmul.f32 %v1444_v23, %v773_v40  ;;  %v939_v0 = vmul.f32 %v1444_v23, %v777_v63  ;;  %v745_v34 = vrot.slane %v688_v54, %v1485_v6  ;;  %v1914_v26 = vadd.f32 %v615_v1, %v1699_v59 }
  0xbc   :  { %v1917_v49 = vadd.f32 %v616_v13, %v1701_v62  ;;  %v940_v15 = vmul.f32 %v1444_v23, %v781_v33  ;;  %v941_v60 = vmul.f32 %v1444_v23, %v785_v10  ;;  %v1923_v20 = vadd.f32 %v936_v30, %v1707_v52 }
  0xbd   :  { %2492 = vst [vmem:[#allocation17_spill] sm:$0xff] %v1914_v26  ;;  %v1926_v40 = vadd.f32 %v937_v19, %v1710_v55  ;;  %v749_v63 = vrot.slane %v688_v54, %v1479_v3  ;;  %v753_v59 = vrot.slane %v688_v54, %v1483_v5  ;;  %v1931_v62 = vadd.f32 %v938_v53, %v1715_v47  ;;  %v1446_v47 = vld [vmem:[%s2453_s0 + $0x4c] sm:$0x7] }
  0xbe   :  { %2493 = vst [vmem:[#allocation18_spill] sm:$0xff] %v1917_v49  ;;  %v1934_v23 = vadd.f32 %v939_v0, %v1718_v8  ;;  %v757_v1 = vrot.slane %v688_v54, %v1493_v12  ;;  %v761_v13 = vrot.slane %v688_v54, %v1491_v11  ;;  %v930_v52 = vmul.f32 %v1443_v58, %v741_v14 }
  0xbf   :  { %v931_v33 = vmul.f32 %v1443_v58, %v745_v34  ;;  %v932_v10 = vmul.f32 %v1443_v58, %v749_v63  ;;  %v933_v55 = vmul.f32 %v1443_v58, %v753_v59  ;;  %v1939_v30 = vadd.f32 %v940_v15, %v1723_v48  ;;  %v702_v48 = vpop.permute.xlu0 %701 }
  0xc0   :  { %v1942_v19 = vadd.f32 %v941_v60, %v1726_v51  ;;  %v813_v8 = vrot.slane %v709_v21, %v1481_v4  ;;  %v817_v53 = vrot.slane %v709_v21, %v1485_v6  ;;  %v934_v0 = vmul.f32 %v1443_v58, %v757_v1 }
  0xc1   :  { %v935_v54 = vmul.f32 %v1443_v58, %v761_v13  ;;  %v1950_v14 = vadd.f32 %v930_v52, %v1734_v43  ;;  %v1953_v34 = vadd.f32 %v931_v33, %v1737_v44  ;;  %v1956_v51 = vadd.f32 %v932_v10, %v1740_v50 }
  0xc2   :  { %v1959_v60 = vadd.f32 %v933_v55, %v1743_v7  ;;  %v821_v15 = vrot.slane %v709_v21, %v1479_v3  ;;  %v825_v63 = vrot.slane %v709_v21, %v1483_v5  ;;  %v829_v59 = vrot.slane %v709_v21, %v1493_v12 }
  0xc3   :  { %v833_v58 = vrot.slane %v709_v21, %v1491_v11  ;;  %v948_v43 = vmul.f32 %v1446_v47, %v813_v8  ;;  %v949_v1 = vmul.f32 %v1446_v47, %v817_v53  ;;  %v789_v52 = vrot.slane %v702_v48, %v1481_v4  ;;  %v1445_v21 = vld [vmem:[%s2453_s0 + $0x48] sm:$0x7] }
  0xc4   :  { %v950_v13 = vmul.f32 %v1446_v47, %v821_v15  ;;  %v951_v44 = vmul.f32 %v1446_v47, %v825_v63  ;;  %v793_v50 = vrot.slane %v702_v48, %v1485_v6  ;;  %v1968_v33 = vadd.f32 %v934_v0, %v1752_v27  ;;  %v723_v0 = vpop.permute.xlu1 %722 }
  0xc5   :  { %v1971_v7 = vadd.f32 %v935_v54, %v1755_v18  ;;  %v952_v10 = vmul.f32 %v1446_v47, %v829_v59  ;;  %v953_v55 = vmul.f32 %v1446_v47, %v833_v58  ;;  %v1977_v8 = vadd.f32 %v948_v43, %v1761_v46 }
  0xc6   :  { %v1980_v53 = vadd.f32 %v949_v1, %v1764_v56  ;;  %v797_v15 = vrot.slane %v702_v48, %v1479_v3  ;;  %v801_v27 = vrot.slane %v702_v48, %v1483_v5  ;;  %v1985_v18 = vadd.f32 %v950_v13, %v1769_v22  ;;  %v1448_v22 = vld [vmem:[%s2453_s0 + $0x54] sm:$0x7] }
  0xc7   :  { %v1988_v47 = vadd.f32 %v951_v44, %v1772_v45  ;;  %v805_v54 = vrot.slane %v702_v48, %v1493_v12  ;;  %v809_v63 = vrot.slane %v702_v48, %v1491_v11  ;;  %v942_v46 = vmul.f32 %v1445_v21, %v789_v52 }
  0xc8   :  { %v943_v59 = vmul.f32 %v1445_v21, %v793_v50  ;;  %v944_v58 = vmul.f32 %v1445_v21, %v797_v15  ;;  %v945_v56 = vmul.f32 %v1445_v21, %v801_v27  ;;  %v1993_v43 = vadd.f32 %v952_v10, %v1777_v9  ;;  %v716_v9 = vpop.permute.xlu0 %715 }
  0xc9   :  { %v1996_v1 = vadd.f32 %v953_v55, %v1780_v16  ;;  %v861_v45 = vrot.slane %v723_v0, %v1481_v4  ;;  %v865_v13 = vrot.slane %v723_v0, %v1485_v6  ;;  %v946_v44 = vmul.f32 %v1445_v21, %v805_v54 }
  0xca   :  { %v947_v48 = vmul.f32 %v1445_v21, %v809_v63  ;;  %v2004_v52 = vadd.f32 %v942_v46, %v1788_v39  ;;  %v2007_v50 = vadd.f32 %v943_v59, %v1791_v17  ;;  %v2010_v16 = vadd.f32 %v944_v58, %v1794_v36 }
  0xcb   :  { %v2013_v10 = vadd.f32 %v945_v56, %v1797_v28  ;;  %v869_v55 = vrot.slane %v723_v0, %v1479_v3  ;;  %v873_v15 = vrot.slane %v723_v0, %v1483_v5  ;;  %v877_v27 = vrot.slane %v723_v0, %v1493_v12 }
  0xcc   :  { %v881_v21 = vrot.slane %v723_v0, %v1491_v11  ;;  %v960_v39 = vmul.f32 %v1448_v22, %v861_v45  ;;  %v961_v54 = vmul.f32 %v1448_v22, %v865_v13  ;;  %v837_v46 = vrot.slane %v716_v9, %v1481_v4  ;;  %v1447_v0 = vld [vmem:[%s2453_s0 + $0x50] sm:$0x7] }
  0xcd   :  { %v962_v63 = vmul.f32 %v1448_v22, %v869_v55  ;;  %v963_v17 = vmul.f32 %v1448_v22, %v873_v15  ;;  %v841_v36 = vrot.slane %v716_v9, %v1485_v6  ;;  %v2022_v59 = vadd.f32 %v946_v44, %v1806_v42  ;;  %v737_v44 = vpop.permute.xlu1 %736 }
  0xce   :  { %v2025_v28 = vadd.f32 %v947_v48, %v1809_v61  ;;  %v964_v58 = vmul.f32 %v1448_v22, %v877_v27  ;;  %v965_v56 = vmul.f32 %v1448_v22, %v881_v21  ;;  %v2031_v45 = vadd.f32 %v960_v39, %v1815_v32 }
  0xcf   :  { %v2034_v13 = vadd.f32 %v961_v54, %v1818_v24  ;;  %v845_v55 = vrot.slane %v716_v9, %v1479_v3  ;;  %v849_v42 = vrot.slane %v716_v9, %v1483_v5  ;;  %v2039_v61 = vadd.f32 %v962_v63, %v1823_v2 }
  0xd0   :  { %v2042_v22 = vadd.f32 %v963_v17, %v1826_v31  ;;  %v853_v48 = vrot.slane %v716_v9, %v1493_v12  ;;  %v857_v15 = vrot.slane %v716_v9, %v1491_v11  ;;  %v954_v32 = vmul.f32 %v1447_v0, %v837_v46  ;;  %v2494_v9 = vld [vmem:[#allocation13_spill] sm:$0xff] }
  0xd1   :  { %v955_v27 = vmul.f32 %v1447_v0, %v841_v36  ;;  %v956_v21 = vmul.f32 %v1447_v0, %v845_v55  ;;  %v957_v24 = vmul.f32 %v1447_v0, %v849_v42  ;;  %v909_v49 = vrot.slane %v737_v44, %v1481_v4  ;;  %v1450_v46 = vld [vmem:[%s2453_s0 + $0x5c] sm:$0x7]  ;;  %v2063_v36 = vpop.permute.xlu0 %729 }
  0xd2   :  { %v958_v39 = vmul.f32 %v1447_v0, %v853_v48  ;;  %v959_v54 = vmul.f32 %v1447_v0, %v857_v15  ;;  %v913_v26 = vrot.slane %v737_v44, %v1485_v6  ;;  %v2049_v2 = vadd.f32 %v964_v58, %v1831_v57  ;;  %v2495_v0 = vld [vmem:[#allocation14_spill] sm:$0xff]  ;;  %v2496_v57 = vld [vmem:[#allocation15_spill] sm:$0xff] }
  0xd3   :  { %v2052_v31 = vadd.f32 %v965_v56, %v1834_v41  ;;  %v2055_v63 = vadd.f32 %v954_v32, %v1842_v25  ;;  %v2058_v17 = vadd.f32 %v955_v27, %v2494_v9  ;;  %v2066_v55 = vadd.f32 %v956_v21, %v2495_v0  ;;  %v2497_v56 = vld [vmem:[#allocation16_spill] sm:$0xff]  ;;  %v2498_v48 = vld [vmem:[#allocation2_spill] sm:$0xff]  ;;  %v1050_v0 = vpop.permute.xlu1 %1049 }
  0xd4   :  { %v2069_v58 = vadd.f32 %v957_v24, %v2496_v57  ;;  %v917_v41 = vrot.slane %v737_v44, %v1479_v3  ;;  %v921_v25 = vrot.slane %v737_v44, %v1483_v5  ;;  %v2074_v42 = vadd.f32 %v958_v39, %v2497_v56  ;;  %v2088_v24 = vld [vmem:[%s2453_s0 + $0x58] sm:$0x7] }
  0xd5   :  { %v2077_v15 = vadd.f32 %v959_v54, %v2498_v48  ;;  %v925_v32 = vrot.slane %v737_v44, %v1493_v12  ;;  %v929_v27 = vrot.slane %v737_v44, %v1491_v11  ;;  %v2081_v21 = vmul.f32 %v1450_v46, %v909_v49 }
  0xd6   :  { %v2083_v9 = vmul.f32 %v1450_v46, %v913_v26  ;;  %v885_v39 = vrot.slane %v2063_v36, %v1481_v4  ;;  %v889_v54 = vrot.slane %v2063_v36, %v1485_v6  ;;  %v2094_v57 = vmul.f32 %v1450_v46, %v917_v41  ;;  %v1453_v41 = vld [vmem:[%s2453_s0 + $0x64] sm:$0x7] }
  0xd7   :  { %2499 = vst [vmem:[#allocation13_spill] sm:$0xff] %v2081_v21  ;;  %v2096_v56 = vmul.f32 %v1450_v46, %v921_v25  ;;  %v893_v26 = vrot.slane %v2063_v36, %v1479_v3  ;;  %v897_v49 = vrot.slane %v2063_v36, %v1483_v5  ;;  %v2102_v44 = vmul.f32 %v1450_v46, %v925_v32  ;;  %v1452_v21 = vld [vmem:[%s2453_s0 + $0x60] sm:$0x7] }
  0xd8   :  { %2500 = vst [vmem:[#allocation14_spill] sm:$0xff] %v2083_v9  ;;  %2501 = vst [vmem:[#allocation15_spill] sm:$0xff] %v2094_v57  ;;  %v2104_v48 = vmul.f32 %v1450_v46, %v929_v27  ;;  %v2114_v25 = vmul.f32 %v2088_v24, %v885_v39  ;;  %v2117_v29 = vmul.f32 %v2088_v24, %v889_v54  ;;  %v1043_v27 = vpop.permute.xlu0 %1042 }
  0xd9   :  { %2502 = vst [vmem:[#allocation16_spill] sm:$0xff] %v2096_v56  ;;  %2503 = vst [vmem:[#allocation2_spill] sm:$0xff] %v2102_v44  ;;  %v1120_v32 = vrot.slane %v1050_v0, %v1481_v4  ;;  %v1124_v46 = vrot.slane %v1050_v0, %v1485_v6  ;;  %v2122_v38 = vmul.f32 %v2088_v24, %v893_v26 }
  0xda   :  { %2504 = vst [vmem:[#allocation19_spill] sm:$0xff] %v2104_v48  ;;  %2505 = vst [vmem:[#allocation20_spill] sm:$0xff] %v2114_v25  ;;  %v2125_v37 = vmul.f32 %v2088_v24, %v897_v49  ;;  %v1128_v48 = vrot.slane %v1050_v0, %v1479_v3  ;;  %v1132_v44 = vrot.slane %v1050_v0, %v1483_v5 }
  0xdb   :  { %2506 = vst [vmem:[#allocation21_spill] sm:$0xff] %v2117_v29  ;;  %2507 = vst [vmem:[#allocation22_spill] sm:$0xff] %v2122_v38  ;;  %v1136_v39 = vrot.slane %v1050_v0, %v1493_v12  ;;  %v1140_v54 = vrot.slane %v1050_v0, %v1491_v11  ;;  %v1291_v29 = vmul.f32 %v1453_v41, %v1120_v32 }
  0xdc   :  { %2508 = vst [vmem:[#allocation23_spill] sm:$0xff] %v2125_v37  ;;  %v1292_v25 = vmul.f32 %v1453_v41, %v1124_v46  ;;  %v1293_v56 = vmul.f32 %v1453_v41, %v1128_v48  ;;  %v1294_v57 = vmul.f32 %v1453_v41, %v1132_v44  ;;  %v1096_v35 = vrot.slane %v1043_v27, %v1481_v4  ;;  %v1064_v46 = vpop.permute.xlu1 %1063 }
  0xdd   :  { %v1100_v26 = vrot.slane %v1043_v27, %v1485_v6  ;;  %v1295_v38 = vmul.f32 %v1453_v41, %v1136_v39  ;;  %v1296_v9 = vmul.f32 %v1453_v41, %v1140_v54  ;;  %v1339_v49 = vadd.f32 %v1291_v29, %v1923_v20  ;;  %v1057_v54 = vpop.permute.xlu0 %1056 }
  0xde   :  { %v1340_v37 = vadd.f32 %v1292_v25, %v1926_v40  ;;  %v1341_v0 = vadd.f32 %v1293_v56, %v1931_v62  ;;  %v1342_v32 = vadd.f32 %v1294_v57, %v1934_v23  ;;  %v1104_v44 = vrot.slane %v1043_v27, %v1479_v3 }
  0xdf   :  { %v1108_v48 = vrot.slane %v1043_v27, %v1483_v5  ;;  %v1343_v39 = vadd.f32 %v1295_v38, %v1939_v30  ;;  %v1344_v41 = vadd.f32 %v1296_v9, %v1942_v19  ;;  %1388 = vst.msk [vmem:[%s2454_s2 + $0x18] sm:$0x7] %vm1381_vm0, %v1339_v49  ;;  %v1112_v29 = vrot.slane %v1043_v27, %v1493_v12  ;;  %v1455_v19 = vld [vmem:[%s2453_s0 + $0x6c] sm:$0x7] }
  0xe0   :  { %1389 = vst.msk [vmem:[%s2454_s2 + $0x1c] sm:$0x7] %vm1381_vm0, %v1340_v37  ;;  %v1116_v20 = vrot.slane %v1043_v27, %v1491_v11  ;;  %1390 = vst.msk [vmem:[%s2454_s2 + $0x20] sm:$0x7] %vm1381_vm0, %v1341_v0  ;;  %v1285_v38 = vmul.f32 %v1452_v21, %v1096_v35  ;;  %v1286_v40 = vmul.f32 %v1452_v21, %v1100_v26 }
  0xe1   :  { %1391 = vst.msk [vmem:[%s2454_s2 + $0x24] sm:$0x7] %vm1381_vm0, %v1342_v32  ;;  %v1287_v62 = vmul.f32 %v1452_v21, %v1104_v44  ;;  %v1288_v23 = vmul.f32 %v1452_v21, %v1108_v48  ;;  %1392 = vst.msk [vmem:[%s2454_s2 + $0x28] sm:$0x7] %vm1381_vm0, %v1343_v39  ;;  %v1289_v37 = vmul.f32 %v1452_v21, %v1112_v29  ;;  %v1454_v29 = vld [vmem:[%s2453_s0 + $0x68] sm:$0x7] }
  0xe2   :  { %1393 = vst.msk [vmem:[%s2454_s2 + $0x2c] sm:$0x7] %vm1381_vm0, %v1344_v41  ;;  %v1290_v30 = vmul.f32 %v1452_v21, %v1116_v20  ;;  %v1168_v35 = vrot.slane %v1064_v46, %v1481_v4  ;;  %v1172_v9 = vrot.slane %v1064_v46, %v1485_v6  ;;  %v1333_v57 = vadd.f32 %v1285_v38, %v1950_v14 }
  0xe3   :  { %v1334_v56 = vadd.f32 %v1286_v40, %v1953_v34  ;;  %v1335_v25 = vadd.f32 %v1287_v62, %v1956_v51  ;;  %v1336_v27 = vadd.f32 %v1288_v23, %v1959_v60  ;;  %v1337_v26 = vadd.f32 %v1289_v37, %v1968_v33  ;;  %v1078_v23 = vpop.permute.xlu1 %1077 }
  0xe4   :  { %v1338_v21 = vadd.f32 %v1290_v30, %v1971_v7  ;;  %v1176_v49 = vrot.slane %v1064_v46, %v1479_v3  ;;  %v1180_v0 = vrot.slane %v1064_v46, %v1483_v5  ;;  %1382 = vst.msk [vmem:[%s2454_s2] sm:$0x7] %vm1381_vm0, %v1333_v57  ;;  %v1184_v14 = vrot.slane %v1064_v46, %v1493_v12 }
  0xe5   :  { %1383 = vst.msk [vmem:[%s2454_s2 + $0x4] sm:$0x7] %vm1381_vm0, %v1334_v56  ;;  %1384 = vst.msk [vmem:[%s2454_s2 + $0x8] sm:$0x7] %vm1381_vm0, %v1335_v25  ;;  %v1188_v34 = vrot.slane %v1064_v46, %v1491_v11  ;;  %v1303_v51 = vmul.f32 %v1455_v19, %v1168_v35  ;;  %v1304_v60 = vmul.f32 %v1455_v19, %v1172_v9  ;;  %v1457_v9 = vld [vmem:[%s2453_s0 + $0x74] sm:$0x7] }
  0xe6   :  { %1385 = vst.msk [vmem:[%s2454_s2 + $0xc] sm:$0x7] %vm1381_vm0, %v1336_v27  ;;  %1386 = vst.msk [vmem:[%s2454_s2 + $0x10] sm:$0x7] %vm1381_vm0, %v1337_v26  ;;  %v1305_v33 = vmul.f32 %v1455_v19, %v1176_v49  ;;  %v1306_v7 = vmul.f32 %v1455_v19, %v1180_v0  ;;  %v1144_v32 = vrot.slane %v1057_v54, %v1481_v4 }
  0xe7   :  { %1387 = vst.msk [vmem:[%s2454_s2 + $0x14] sm:$0x7] %vm1381_vm0, %v1338_v21  ;;  %v1148_v44 = vrot.slane %v1057_v54, %v1485_v6  ;;  %v1307_v48 = vmul.f32 %v1455_v19, %v1184_v14  ;;  %v1308_v46 = vmul.f32 %v1455_v19, %v1188_v34  ;;  %v1351_v39 = vadd.f32 %v1303_v51, %v1977_v8  ;;  %v1071_v21 = vpop.permute.xlu0 %1070 }
  0xe8   :  { %v1352_v41 = vadd.f32 %v1304_v60, %v1980_v53  ;;  %v1353_v20 = vadd.f32 %v1305_v33, %v1985_v18  ;;  %v1354_v38 = vadd.f32 %v1306_v7, %v1988_v47  ;;  %v1152_v40 = vrot.slane %v1057_v54, %v1479_v3 }
  0xe9   :  { %v1156_v62 = vrot.slane %v1057_v54, %v1483_v5  ;;  %v1355_v37 = vadd.f32 %v1307_v48, %v1993_v43  ;;  %v1356_v30 = vadd.f32 %v1308_v46, %v1996_v1  ;;  %1400 = vst.msk [vmem:[%s2454_s2 + $0x48] sm:$0x7] %vm1381_vm0, %v1351_v39  ;;  %v1160_v8 = vrot.slane %v1057_v54, %v1493_v12  ;;  %v1456_v48 = vld [vmem:[%s2453_s0 + $0x70] sm:$0x7] }
  0xea   :  { %1401 = vst.msk [vmem:[%s2454_s2 + $0x4c] sm:$0x7] %vm1381_vm0, %v1352_v41  ;;  %v1164_v53 = vrot.slane %v1057_v54, %v1491_v11  ;;  %1402 = vst.msk [vmem:[%s2454_s2 + $0x50] sm:$0x7] %vm1381_vm0, %v1353_v20  ;;  %v1297_v18 = vmul.f32 %v1454_v29, %v1144_v32  ;;  %v1298_v47 = vmul.f32 %v1454_v29, %v1148_v44 }
  0xeb   :  { %1403 = vst.msk [vmem:[%s2454_s2 + $0x54] sm:$0x7] %vm1381_vm0, %v1354_v38  ;;  %v1299_v43 = vmul.f32 %v1454_v29, %v1152_v40  ;;  %v1300_v1 = vmul.f32 %v1454_v29, %v1156_v62  ;;  %1404 = vst.msk [vmem:[%s2454_s2 + $0x58] sm:$0x7] %vm1381_vm0, %v1355_v37  ;;  %v1301_v19 = vmul.f32 %v1454_v29, %v1160_v8 }
  0xec   :  { %1405 = vst.msk [vmem:[%s2454_s2 + $0x5c] sm:$0x7] %vm1381_vm0, %v1356_v30  ;;  %v1302_v35 = vmul.f32 %v1454_v29, %v1164_v53  ;;  %v1216_v57 = vrot.slane %v1078_v23, %v1481_v4  ;;  %v1220_v56 = vrot.slane %v1078_v23, %v1485_v6  ;;  %v1345_v25 = vadd.f32 %v1297_v18, %v2004_v52  ;;  %v1092_v53 = vpop.permute.xlu1 %1091 }
  0xed   :  { %v1346_v27 = vadd.f32 %v1298_v47, %v2007_v50  ;;  %v1347_v54 = vadd.f32 %v1299_v43, %v2010_v16  ;;  %v1348_v26 = vadd.f32 %v1300_v1, %v2013_v10  ;;  %v1349_v49 = vadd.f32 %v1301_v19, %v2022_v59  ;;  %v2511_v19 = vld [vmem:[#allocation3_spill] sm:$0xff] }
  0xee   :  { %v1350_v0 = vadd.f32 %v1302_v35, %v2025_v28  ;;  %v1224_v14 = vrot.slane %v1078_v23, %v1479_v3  ;;  %v1228_v34 = vrot.slane %v1078_v23, %v1483_v5  ;;  %1394 = vst.msk [vmem:[%s2454_s2 + $0x30] sm:$0x7] %vm1381_vm0, %v1345_v25  ;;  %v1232_v52 = vrot.slane %v1078_v23, %v1493_v12  ;;  %v2512_v35 = vld [vmem:[#allocation13_spill] sm:$0xff] }
  0xef   :  { %1395 = vst.msk [vmem:[%s2454_s2 + $0x34] sm:$0x7] %vm1381_vm0, %v1346_v27  ;;  %1396 = vst.msk [vmem:[%s2454_s2 + $0x38] sm:$0x7] %vm1381_vm0, %v1347_v54  ;;  %v1236_v50 = vrot.slane %v1078_v23, %v1491_v11  ;;  %v1315_v16 = vmul.f32 %v1457_v9, %v1216_v57  ;;  %v1316_v10 = vmul.f32 %v1457_v9, %v1220_v56  ;;  %v2513_v57 = vld [vmem:[#allocation4_spill] sm:$0xff]  ;;  %v2514_v56 = vld [vmem:[#allocation14_spill] sm:$0xff] }
  0xf0   :  { %1397 = vst.msk [vmem:[%s2454_s2 + $0x3c] sm:$0x7] %vm1381_vm0, %v1348_v26  ;;  %1398 = vst.msk [vmem:[%s2454_s2 + $0x40] sm:$0x7] %vm1381_vm0, %v1349_v49  ;;  %v1317_v59 = vmul.f32 %v1457_v9, %v1224_v14  ;;  %v1318_v28 = vmul.f32 %v1457_v9, %v1228_v34  ;;  %v1192_v51 = vrot.slane %v1071_v21, %v1481_v4  ;;  %v2519_v34 = vld [vmem:[#allocation7_spill] sm:$0xff] }
  0xf1   :  { %1399 = vst.msk [vmem:[%s2454_s2 + $0x44] sm:$0x7] %vm1381_vm0, %v1350_v0  ;;  %v1196_v60 = vrot.slane %v1071_v21, %v1485_v6  ;;  %v1319_v33 = vmul.f32 %v1457_v9, %v1232_v52  ;;  %v1320_v7 = vmul.f32 %v1457_v9, %v1236_v50  ;;  %v1363_v32 = vadd.f32 %v1315_v16, %v2031_v45  ;;  %v2520_v52 = vld [vmem:[#allocation2_spill] sm:$0xff]  ;;  %v2521_v16 = vld [vmem:[#allocation8_spill] sm:$0xff] }
  0xf2   :  { %v1364_v44 = vadd.f32 %v1316_v10, %v2034_v13  ;;  %v1365_v46 = vadd.f32 %v1317_v59, %v2039_v61  ;;  %v1366_v39 = vadd.f32 %v1318_v28, %v2042_v22  ;;  %v1200_v41 = vrot.slane %v1071_v21, %v1479_v3  ;;  %v2522_v10 = vld [vmem:[#allocation19_spill] sm:$0xff] }
  0xf3   :  { %v1204_v29 = vrot.slane %v1071_v21, %v1483_v5  ;;  %v1367_v20 = vadd.f32 %v1319_v33, %v2049_v2  ;;  %v1368_v38 = vadd.f32 %v1320_v7, %v2052_v31  ;;  %1412 = vst.msk [vmem:[%s2454_s2 + $0x78] sm:$0x7] %vm1381_vm0, %v1363_v32  ;;  %v1208_v45 = vrot.slane %v1071_v21, %v1493_v12 }
  0xf4   :  { %1413 = vst.msk [vmem:[%s2454_s2 + $0x7c] sm:$0x7] %vm1381_vm0, %v1364_v44  ;;  %v1212_v13 = vrot.slane %v1071_v21, %v1491_v11  ;;  %1414 = vst.msk [vmem:[%s2454_s2 + $0x80] sm:$0x7] %vm1381_vm0, %v1365_v46  ;;  %v1309_v61 = vmul.f32 %v1456_v48, %v1192_v51  ;;  %v1310_v22 = vmul.f32 %v1456_v48, %v1196_v60  ;;  %v1085_v44 = vpop.permute.xlu0 %1084 }
  0xf5   :  { %1415 = vst.msk [vmem:[%s2454_s2 + $0x84] sm:$0x7] %vm1381_vm0, %v1366_v39  ;;  %v1311_v2 = vmul.f32 %v1456_v48, %v1200_v41  ;;  %v1312_v31 = vmul.f32 %v1456_v48, %v1204_v29  ;;  %v2509_v40 = vrot.slane %v2063_v36, %v1493_v12  ;;  %v2510_v23 = vrot.slane %v2063_v36, %v1491_v11  ;;  %v2523_v39 = vld [vmem:[#allocation9_spill] sm:$0xff]  ;;  %v2524_v41 = vld [vmem:[#allocation20_spill] sm:$0xff] }
  0xf6   :  { %1416 = vst.msk [vmem:[%s2454_s2 + $0x88] sm:$0x7] %vm1381_vm0, %v1367_v20  ;;  %1417 = vst.msk [vmem:[%s2454_s2 + $0x8c] sm:$0x7] %vm1381_vm0, %v1368_v38  ;;  %v1313_v30 = vmul.f32 %v1456_v48, %v1208_v45  ;;  %v1314_v8 = vmul.f32 %v1456_v48, %v1212_v13  ;;  %v1357_v18 = vadd.f32 %v1309_v61, %v2055_v63  ;;  %v1459_v63 = vld [vmem:[%s2453_s0 + $0x7c] sm:$0x7] }
  0xf7   :  { %v970_v62 = vmul.f32 %v2088_v24, %v2509_v40  ;;  %v971_v37 = vmul.f32 %v2088_v24, %v2510_v23  ;;  %v1358_v47 = vadd.f32 %v1310_v22, %v2058_v17  ;;  %v1359_v36 = vadd.f32 %v1311_v2, %v2066_v55  ;;  %v2515_v17 = vld [vmem:[#allocation5_spill] sm:$0xff]  ;;  %v2516_v55 = vld [vmem:[#allocation15_spill] sm:$0xff]  ;;  %v2525_v20 = vld [vmem:[#allocation10_spill] sm:$0xff] }
  0xf8   :  { %v1360_v24 = vadd.f32 %v1312_v31, %v2069_v58  ;;  %v1361_v43 = vadd.f32 %v1313_v30, %v2074_v42  ;;  %v1362_v1 = vadd.f32 %v1314_v8, %v2077_v15  ;;  %v1020_v9 = vadd.f32 %v2512_v35, %v2511_v19  ;;  %1406 = vst.msk [vmem:[%s2454_s2 + $0x60] sm:$0x7] %vm1381_vm0, %v1357_v18  ;;  %v2517_v42 = vld [vmem:[#allocation6_spill] sm:$0xff]  ;;  %v2518_v15 = vld [vmem:[#allocation16_spill] sm:$0xff]  ;;  %v2526_v38 = vld [vmem:[#allocation21_spill] sm:$0xff] }
  0xf9   :  { %v1021_v25 = vadd.f32 %v2514_v56, %v2513_v57  ;;  %1407 = vst.msk [vmem:[%s2454_s2 + $0x64] sm:$0x7] %vm1381_vm0, %v1358_v47  ;;  %1408 = vst.msk [vmem:[%s2454_s2 + $0x68] sm:$0x7] %vm1381_vm0, %v1359_v36  ;;  %v1022_v58 = vadd.f32 %v2516_v55, %v2515_v17  ;;  %v1023_v27 = vadd.f32 %v2518_v15, %v2517_v42  ;;  %v1458_v31 = vld [vmem:[%s2453_s0 + $0x78] sm:$0x7] }
  0xfa   :  { %1409 = vst.msk [vmem:[%s2454_s2 + $0x6c] sm:$0x7] %vm1381_vm0, %v1360_v24  ;;  %v1264_v54 = vrot.slane %v1092_v53, %v1481_v4  ;;  %v1268_v26 = vrot.slane %v1092_v53, %v1485_v6  ;;  %1410 = vst.msk [vmem:[%s2454_s2 + $0x70] sm:$0x7] %vm1381_vm0, %v1361_v43  ;;  %v1272_v21 = vrot.slane %v1092_v53, %v1479_v3  ;;  %v2527_v40 = vld [vmem:[#allocation11_spill] sm:$0xff]  ;;  %v2528_v23 = vld [vmem:[#allocation22_spill] sm:$0xff] }
  0xfb   :  { %1411 = vst.msk [vmem:[%s2454_s2 + $0x74] sm:$0x7] %vm1381_vm0, %v1362_v1  ;;  %v1276_v49 = vrot.slane %v1092_v53, %v1483_v5  ;;  %v1280_v0 = vrot.slane %v1092_v53, %v1493_v12  ;;  %v1284_v14 = vrot.slane %v1092_v53, %v1491_v11  ;;  %v1024_v50 = vadd.f32 %v2520_v52, %v2519_v34  ;;  %v2529_v8 = vld [vmem:[#allocation12_spill] sm:$0xff]  ;;  %v2530_v53 = vld [vmem:[#allocation23_spill] sm:$0xff]  ;;  %v2531_v1 = vld [vmem:[#allocation17_spill] sm:$0xff] }
  0xfc   :  { %v1025_v59 = vadd.f32 %v2522_v10, %v2521_v16  ;;  %v1327_v28 = vmul.f32 %v1459_v63, %v1264_v54  ;;  %v1328_v51 = vmul.f32 %v1459_v63, %v1268_v26  ;;  %v1329_v60 = vmul.f32 %v1459_v63, %v1272_v21  ;;  %v2532_v35 = vld [vmem:[#allocation18_spill] sm:$0xff] }
  0xfd   :  { %v1330_v33 = vmul.f32 %v1459_v63, %v1276_v49  ;;  %v1331_v7 = vmul.f32 %v1459_v63, %v1280_v0  ;;  %v1332_v32 = vmul.f32 %v1459_v63, %v1284_v14  ;;  %v1014_v29 = vadd.f32 %v2524_v41, %v2523_v39 }
  0xfe   :  { %v1375_v48 = vadd.f32 %v1327_v28, %v1020_v9  ;;  %v1376_v46 = vadd.f32 %v1328_v51, %v1021_v25  ;;  %v1015_v45 = vadd.f32 %v2526_v38, %v2525_v20  ;;  %v1377_v13 = vadd.f32 %v1329_v60, %v1022_v58 }
  0xff   :  { %v1378_v61 = vadd.f32 %v1330_v33, %v1023_v27  ;;  %v1379_v22 = vadd.f32 %v1331_v7, %v1024_v50  ;;  %v1380_v2 = vadd.f32 %v1332_v32, %v1025_v59  ;;  %v1016_v30 = vadd.f32 %v2528_v23, %v2527_v40 }
 0x100   :  { %1424 = vst.msk [vmem:[%s2454_s2 + $0xa8] sm:$0x7] %vm1381_vm0, %v1375_v48  ;;  %1425 = vst.msk [vmem:[%s2454_s2 + $0xac] sm:$0x7] %vm1381_vm0, %v1376_v46  ;;  %v1017_v18 = vadd.f32 %v2530_v53, %v2529_v8  ;;  %v1240_v47 = vrot.slane %v1085_v44, %v1481_v4  ;;  %v1244_v36 = vrot.slane %v1085_v44, %v1485_v6 }
 0x101   :  { %1426 = vst.msk [vmem:[%s2454_s2 + $0xb0] sm:$0x7] %vm1381_vm0, %v1377_v13  ;;  %1427 = vst.msk [vmem:[%s2454_s2 + $0xb4] sm:$0x7] %vm1381_vm0, %v1378_v61  ;;  %v1248_v4 = vrot.slane %v1085_v44, %v1479_v3  ;;  %v1252_v6 = vrot.slane %v1085_v44, %v1483_v5  ;;  %v1256_v24 = vrot.slane %v1085_v44, %v1493_v12 }
 0x102   :  { %1428 = vst.msk [vmem:[%s2454_s2 + $0xb8] sm:$0x7] %vm1381_vm0, %v1379_v22  ;;  %1429 = vst.msk [vmem:[%s2454_s2 + $0xbc] sm:$0x7] %vm1381_vm0, %v1380_v2  ;;  %v1260_v43 = vrot.slane %v1085_v44, %v1491_v11  ;;  %v1018_v19 = vadd.f32 %v970_v62, %v2531_v1  ;;  %v1019_v9 = vadd.f32 %v971_v37, %v2532_v35 }
 0x103   :  { %v1321_v57 = vmul.f32 %v1458_v31, %v1240_v47  ;;  %v1322_v56 = vmul.f32 %v1458_v31, %v1244_v36  ;;  %v1323_v25 = vmul.f32 %v1458_v31, %v1248_v4  ;;  %v1324_v63 = vmul.f32 %v1458_v31, %v1252_v6 }
 0x104   :  { %v1325_v17 = vmul.f32 %v1458_v31, %v1256_v24  ;;  %v1326_v55 = vmul.f32 %v1458_v31, %v1260_v43 }
 0x105   :  { %v1369_v58 = vadd.f32 %v1321_v57, %v1014_v29  ;;  %v1370_v42 = vadd.f32 %v1322_v56, %v1015_v45  ;;  %v1371_v15 = vadd.f32 %v1323_v25, %v1016_v30  ;;  %v1372_v3 = vadd.f32 %v1324_v63, %v1017_v18 }
 0x106   :  { %v1373_v27 = vadd.f32 %v1325_v17, %v1018_v19  ;;  %v1374_v5 = vadd.f32 %v1326_v55, %v1019_v9 }
 0x107   :  { %1418 = vst.msk [vmem:[%s2454_s2 + $0x90] sm:$0x7] %vm1381_vm0, %v1369_v58  ;;  %1419 = vst.msk [vmem:[%s2454_s2 + $0x94] sm:$0x7] %vm1381_vm0, %v1370_v42 }
 0x108   :  { %1420 = vst.msk [vmem:[%s2454_s2 + $0x98] sm:$0x7] %vm1381_vm0, %v1371_v15  ;;  %1421 = vst.msk [vmem:[%s2454_s2 + $0x9c] sm:$0x7] %vm1381_vm0, %v1372_v3 }
 0x109   :  { %1422 = vst.msk [vmem:[%s2454_s2 + $0xa0] sm:$0x7] %vm1381_vm0, %v1373_v27  ;;  %1423 = vst.msk [vmem:[%s2454_s2 + $0xa4] sm:$0x7] %vm1381_vm0, %v1374_v5 }

</bundles_post_ra>
